<compile_context>
chip_gen: v7x
topology: tpu7x:2x2x1
jax: 0.10.0
libtpu: 0.0.40
codegen_flags: <defaults>
</compile_context>

<pallas_src>
import functools
import math

import jax
import jax.numpy as jnp
from jax.experimental import pallas as pl
from jax.experimental.pallas import tpu as pltpu


_VMEM_BLOCK_BUDGET = 16 * 1024 * 1024     # budget for double-buffered input blocks
_VMEM_LIMIT = 48 * 1024 * 1024            # explicit scoped-VMEM limit (safe on v5e/v6e/v7x)


def _pick_batch_tile(B, cap=256):
    """Sublane (batch) tile: a multiple of 8 that divides B exactly, or all of B."""
    if B % 8 != 0:
        return B
    return 8 * math.gcd(B // 8, cap // 8)


def _pick_lane_tile(N, bytes_per_col, budget=_VMEM_BLOCK_BUDGET):
    """Largest layout-legal lane tile: the full axis N, or a big multiple of 128."""
    max_cols = budget // max(1, bytes_per_col)
    if max_cols >= N:
        return N
    return max(128, (max_cols // 128) * 128)


def _compiler_params():
    return pltpu.CompilerParams(
        dimension_semantics=("parallel", "arbitrary"),
        vmem_limit_bytes=_VMEM_LIMIT,
    )


# --------------------------------------------------------------------------
# Cross-entropy kernel: per-batch-row mean CE over positions.
# --------------------------------------------------------------------------
def _ce_kernel(logits_ref, tgt_ref, o_ref, acc_ref, *, seq_len):
    """logits_ref: (1, C, ts); tgt_ref: (1, 1, ts) i32; o_ref: (1, 1, 1) f32;
    acc_ref: (1, ts) f32 lane-partial accumulator over position tiles."""
    s_idx = pl.program_id(1)
    ts = acc_ref.shape[1]

    @pl.when(s_idx == 0)
    def _():
        acc_ref[...] = jnp.zeros_like(acc_ref)

    x = logits_ref[0].astype(jnp.float32)            # (C, ts), cast in-kernel
    tgt = tgt_ref[0]                                 # (1, ts) int32
    C = x.shape[0]

    # stable logsumexp over the class (sublane) axis
    m = jnp.max(x, axis=0, keepdims=True)            # (1, ts)
    lse = m + jnp.log(jnp.sum(jnp.exp(x - m), axis=0, keepdims=True))

    # logit of the target class via a one-hot sublane mask
    cls = jax.lax.broadcasted_iota(jnp.int32, (C, ts), 0)
    picked = jnp.sum(jnp.where(cls == tgt, x, 0.0), axis=0, keepdims=True)

    # mask positions past the true sequence length (ragged last tile)
    pos = s_idx * ts + jax.lax.broadcasted_iota(jnp.int32, (1, ts), 1)
    acc_ref[...] += jnp.where(pos < seq_len, lse - picked, 0.0)

    @pl.when(s_idx == pl.num_programs(1) - 1)
    def _():
        row_mean = jnp.sum(acc_ref[...], axis=1, keepdims=True) * (1.0 / seq_len)
        o_ref[0] = row_mean                          # (1, 1) -> output block (1,1,1)


def ce_per_sample(logits, targets):
    """loss[b] = mean_s CE(logits[b, :, s], targets[b, s]). logits: (B, C, S)."""
    B, C, S = logits.shape
    targets = targets.reshape(B, 1, S).astype(jnp.int32)   # free, contiguous reshape

    # bytes streamed per lane column: double-buffered logits + targets, + f32 acc
    bytes_per_col = 2 * (C * logits.dtype.itemsize + 4) + 4
    ts = _pick_lane_tile(S, bytes_per_col)
    # TODO(synk): assumes the class axis C fits one VMEM block; a very large
    # vocabulary would need a class-tiled online-logsumexp variant.

    out = pl.pallas_call(
        functools.partial(_ce_kernel, seq_len=S),
        out_shape=jax.ShapeDtypeStruct((B, 1, 1), jnp.float32),
        grid_spec=pltpu.PrefetchScalarGridSpec(
            num_scalar_prefetch=0,
            grid=(B, pl.cdiv(S, ts)),
            in_specs=[
                pl.BlockSpec((1, C, ts), lambda b, s: (b, 0, s)),
                pl.BlockSpec((1, 1, ts), lambda b, s: (b, 0, s)),
            ],
            out_specs=pl.BlockSpec((1, 1, 1), lambda b, s: (b, 0, 0)),
            scratch_shapes=[pltpu.VMEM((1, ts), jnp.float32)],
        ),
        compiler_params=_compiler_params(),
    )(logits, targets)
    return out[:, 0, 0]


# --------------------------------------------------------------------------
# Guided term: sum_i penalty * ||gi[i] - gt[i]||_F^2 per sample, fused over maps.
# --------------------------------------------------------------------------
def _guided_kernel(*refs, num_maps, num_cols, penalty):
    """refs = gi_0..gi_{L-1}, gt_0..gt_{L-1}, o_ref, acc_ref.
    gi/gt refs: (tb, tn); o_ref: (tb, 1) f32; acc_ref: (tb, tn) f32."""
    gi = refs[:num_maps]
    gt = refs[num_maps:2 * num_maps]
    o_ref = refs[2 * num_maps]
    acc_ref = refs[2 * num_maps + 1]
    k = pl.program_id(1)
    tn = acc_ref.shape[1]

    @pl.when(k == 0)
    def _():
        acc_ref[...] = jnp.zeros_like(acc_ref)

    partial = jnp.zeros(acc_ref.shape, jnp.float32)
    for i in range(num_maps):                        # static unroll over the L maps
        d = gi[i][...].astype(jnp.float32) - gt[i][...].astype(jnp.float32)
        partial += d * d

    # mask lanes past the true flattened feature width (ragged last tile)
    col = k * tn + jax.lax.broadcasted_iota(jnp.int32, acc_ref.shape, 1)
    acc_ref[...] += jnp.where(col < num_cols, partial, 0.0)

    @pl.when(k == pl.num_programs(1) - 1)
    def _():
        o_ref[...] = penalty * jnp.sum(acc_ref[...], axis=1, keepdims=True)


def _guided_call(gi, gt, penalty):
    """All maps share the same flattened width N. gi/gt: lists of (B, N)."""
    L = len(gi)
    B, N = gi[0].shape
    itemsize = gi[0].dtype.itemsize

    tb = _pick_batch_tile(B)
    # 2L input streams, double-buffered, + f32 accumulator
    bytes_per_col = tb * (4 * L * itemsize + 4)
    tn = _pick_lane_tile(N, bytes_per_col)

    spec = pl.BlockSpec((tb, tn), lambda i, k: (i, k))
    out = pl.pallas_call(
        functools.partial(_guided_kernel, num_maps=L, num_cols=N, penalty=penalty),
        out_shape=jax.ShapeDtypeStruct((B, 1), jnp.float32),
        grid_spec=pltpu.PrefetchScalarGridSpec(
            num_scalar_prefetch=0,
            grid=(B // tb, pl.cdiv(N, tn)),
            in_specs=[spec] * (2 * L),
            out_specs=pl.BlockSpec((tb, 1), lambda i, k: (i, 0)),
            scratch_shapes=[pltpu.VMEM((tb, tn), jnp.float32)],
        ),
        compiler_params=_compiler_params(),
    )(*gi, *gt)
    return out[:, 0]


def guided_sq_term(guided_in, guided_tg, penalty):
    """guided[b] = sum_i penalty * ||guided_in[i][b] - guided_tg[i][b]||_F^2."""
    B = guided_in[0].shape[0]
    # (B, H, W) -> (B, H*W) is a contiguous (free) reshape -- no jnp.stack HBM copy.
    gi = [g.reshape(B, -1) for g in guided_in]
    gt = [g.reshape(B, -1) for g in guided_tg]

    widths = sorted({g.shape[1] for g in gi})
    if len(widths) == 1:
        return _guided_call(gi, gt, penalty)
    # heterogeneous map shapes: one fused call per distinct flattened width
    total = jnp.zeros((B,), jnp.float32)
    for w in widths:
        sub_i = [a for a in gi if a.shape[1] == w]
        sub_t = [b for a, b in zip(gi, gt) if a.shape[1] == w]
        total = total + _guided_call(sub_i, sub_t, penalty)
    return total


# --------------------------------------------------------------------------
# Full forward pass.
# --------------------------------------------------------------------------
def ce_loss(inputs, targets, penalty=0.0):
    """Pallas equivalent of ghmclip CELoss.forward.

    inputs  = (logits: (B, C, S), guided_in: list of (B, H, W))
    targets = (labels: (B, S) int, guided_tg: list of (B, H, W))

    Returns (total_loss.mean(), loss.mean(), guided_term.mean()) as device
    scalars. The PyTorch reference calls .item() on the last two; we leave
    that host sync to the caller so the whole loss stays jittable.
    """
    logits, guided_in = inputs
    labels, guided_tg = targets
    B = logits.shape[0]

    loss = ce_per_sample(logits, labels)                                   # (B,)

    if penalty != 0:
        guided_term = guided_sq_term(guided_in, guided_tg, penalty)        # (B,)
        total_loss = loss + guided_term
    else:
        guided_term = jnp.zeros((B,), jnp.float32)
        # TODO(synk): the PyTorch reference leaves total_loss undefined when
        # penalty == 0 (UnboundLocalError); we fall back to `loss` here.
        total_loss = loss

    return total_loss.mean(), loss.mean(), guided_term.mean()


if __name__ == "__main__":
    key = jax.random.PRNGKey(0)
    k1, k2, k3, k4 = jax.random.split(key, 4)

    B, C, S = 2, 4, 8          # batch, classes, positions -> logits (B, C, S)
    L, H, W = 3, 16, 16        # guided feature maps, each (B, H, W)
    penalty = 0.5

    logits = jax.random.normal(k1, (B, C, S), jnp.float32)
    labels = jax.random.randint(k2, (B, S), 0, C, jnp.int32)
    guided_in = [jax.random.normal(gk, (B, H, W), jnp.float32)
                 for gk in jax.random.split(k3, L)]
    guided_tg = [jax.random.normal(tk, (B, H, W), jnp.float32)
                 for tk in jax.random.split(k4, L)]

    loss_fn = jax.jit(lambda lg, lb, gi, gt:
                      ce_loss((lg, gi), (lb, gt), penalty=penalty))
    total, loss_mean, guided_mean = loss_fn(logits, labels, guided_in, guided_tg)
    total = jax.block_until_ready(total)

    # Pure-JAX reference (same math as the PyTorch module).
    m = logits.max(axis=1, keepdims=True)
    lse = (m + jnp.log(jnp.exp(logits - m).sum(axis=1, keepdims=True)))[:, 0, :]
    picked = jnp.take_along_axis(logits, labels[:, None, :], axis=1)[:, 0, :]
    ref_loss = (lse - picked).mean(axis=1)                                 # (B,)
    ref_guided = sum(penalty * jnp.sum((gi - gt) ** 2, axis=(1, 2))
                     for gi, gt in zip(guided_in, guided_tg))              # (B,)
    ref_total = (ref_loss + ref_guided).mean()

    assert jnp.allclose(total, ref_total, rtol=1e-5, atol=1e-4), (total, ref_total)
    assert jnp.allclose(loss_mean, ref_loss.mean(), rtol=1e-5, atol=1e-4)
    assert jnp.allclose(guided_mean, ref_guided.mean(), rtol=1e-5, atol=1e-4)

    print("KERNEL_OK")
</pallas_src>

<mosaic_0001>
module attributes {stable_mosaic.version = 11 : i64} {
  func.func @_guided_kernel(%arg0: i32, %arg1: i32, %arg2: memref<2x256xf32, #tpu.memory_space<vmem>>, %arg3: memref<2x256xf32, #tpu.memory_space<vmem>>, %arg4: memref<2x256xf32, #tpu.memory_space<vmem>>, %arg5: memref<2x256xf32, #tpu.memory_space<vmem>>, %arg6: memref<2x256xf32, #tpu.memory_space<vmem>>, %arg7: memref<2x256xf32, #tpu.memory_space<vmem>>, %arg8: memref<2x1xf32, #tpu.memory_space<vmem>>, %arg9: memref<2x256xf32, #tpu.memory_space<vmem>>) attributes {dimension_semantics = [#tpu.dimension_semantics<parallel>, #tpu.dimension_semantics<arbitrary>], iteration_bounds = array<i64: 1, 1>, scalar_prefetch = 0 : i64, scratch_operands = 1 : i64, tpu.core_type = #tpu.core_type<tc>, window_params = [{transform_indices = @transform_0, window_bounds = array<i64: 2, 256>}, {transform_indices = @transform_1, window_bounds = array<i64: 2, 256>}, {transform_indices = @transform_2, window_bounds = array<i64: 2, 256>}, {transform_indices = @transform_3, window_bounds = array<i64: 2, 256>}, {transform_indices = @transform_4, window_bounds = array<i64: 2, 256>}, {transform_indices = @transform_5, window_bounds = array<i64: 2, 256>}, {transform_indices = @transform_6, window_bounds = array<i64: 2, 1>}]} {
    %c0_i32 = arith.constant 0 : i32
    %0 = arith.cmpi eq, %arg1, %c0_i32 : i32
    %1 = arith.extui %0 : i1 to i32
    %c0_i32_0 = arith.constant 0 : i32
    %2 = arith.cmpi ne, %1, %c0_i32_0 : i32
    scf.if %2 {
      %cst_20 = arith.constant 0.000000e+00 : f32
      %33 = vector.broadcast %cst_20 : f32 to vector<2x256xf32>
      %c0_21 = arith.constant 0 : index
      %c0_22 = arith.constant 0 : index
      %34 = vector.load %arg9[%c0_21, %c0_22] : memref<2x256xf32, #tpu.memory_space<vmem>>, vector<2x256xf32>
      tpu.vector_store %arg9[%c0_21, %c0_22], %33 {strides = array<i32>} : memref<2x256xf32, #tpu.memory_space<vmem>>, vector<2x256xf32>,
    } else {
    }
    %cst = arith.constant 0.000000e+00 : f32
    %3 = vector.broadcast %cst : f32 to vector<2x256xf32>
    %c0 = arith.constant 0 : index
    %c0_1 = arith.constant 0 : index
    %4 = vector.load %arg2[%c0, %c0_1] : memref<2x256xf32, #tpu.memory_space<vmem>>, vector<2x256xf32>
    %c0_2 = arith.constant 0 : index
    %c0_3 = arith.constant 0 : index
    %5 = vector.load %arg5[%c0_2, %c0_3] : memref<2x256xf32, #tpu.memory_space<vmem>>, vector<2x256xf32>
    %6 = arith.subf %4, %5 : vector<2x256xf32>
    %7 = arith.mulf %6, %6 : vector<2x256xf32>
    %8 = arith.addf %3, %7 : vector<2x256xf32>
    %c0_4 = arith.constant 0 : index
    %c0_5 = arith.constant 0 : index
    %9 = vector.load %arg3[%c0_4, %c0_5] : memref<2x256xf32, #tpu.memory_space<vmem>>, vector<2x256xf32>
    %c0_6 = arith.constant 0 : index
    %c0_7 = arith.constant 0 : index
    %10 = vector.load %arg6[%c0_6, %c0_7] : memref<2x256xf32, #tpu.memory_space<vmem>>, vector<2x256xf32>
    %11 = arith.subf %9, %10 : vector<2x256xf32>
    %12 = arith.mulf %11, %11 : vector<2x256xf32>
    %13 = arith.addf %8, %12 : vector<2x256xf32>
    %c0_8 = arith.constant 0 : index
    %c0_9 = arith.constant 0 : index
    %14 = vector.load %arg4[%c0_8, %c0_9] : memref<2x256xf32, #tpu.memory_space<vmem>>, vector<2x256xf32>
    %c0_10 = arith.constant 0 : index
    %c0_11 = arith.constant 0 : index
    %15 = vector.load %arg7[%c0_10, %c0_11] : memref<2x256xf32, #tpu.memory_space<vmem>>, vector<2x256xf32>
    %16 = arith.subf %14, %15 : vector<2x256xf32>
    %17 = arith.mulf %16, %16 : vector<2x256xf32>
    %18 = arith.addf %13, %17 : vector<2x256xf32>
    %c256_i32 = arith.constant 256 : i32
    %19 = arith.muli %arg1, %c256_i32 : i32
    %20 = tpu.iota {dimensions = array<i32: 1>} : vector<2x256xi32>
    %21 = vector.broadcast %19 : i32 to vector<2x256xi32>
    %22 = arith.addi %21, %20 : vector<2x256xi32>
    %c0_12 = arith.constant 0 : index
    %c0_13 = arith.constant 0 : index
    %23 = vector.load %arg9[%c0_12, %c0_13] : memref<2x256xf32, #tpu.memory_space<vmem>>, vector<2x256xf32>
    %c256_i32_14 = arith.constant 256 : i32
    %24 = vector.broadcast %c256_i32_14 : i32 to vector<2x256xi32>
    %25 = arith.cmpi slt, %22, %24 : vector<2x256xi32>
    %cst_15 = arith.constant 0.000000e+00 : f32
    %26 = vector.broadcast %cst_15 : f32 to vector<2x256xf32>
    %27 = arith.select %25, %18, %26 : vector<2x256xi1>, vector<2x256xf32>
    %28 = arith.addf %23, %27 : vector<2x256xf32>
    %c0_16 = arith.constant 0 : index
    %c0_17 = arith.constant 0 : index
    %29 = vector.load %arg9[%c0_16, %c0_17] : memref<2x256xf32, #tpu.memory_space<vmem>>, vector<2x256xf32>
    tpu.vector_store %arg9[%c0_16, %c0_17], %28 {strides = array<i32>} : memref<2x256xf32, #tpu.memory_space<vmem>>, vector<2x256xf32>,
    %c0_i32_18 = arith.constant 0 : i32
    %30 = arith.cmpi eq, %arg1, %c0_i32_18 : i32
    %31 = arith.extui %30 : i1 to i32
    %c0_i32_19 = arith.constant 0 : i32
    %32 = arith.cmpi ne, %31, %c0_i32_19 : i32
    scf.if %32 {
      %c0_20 = arith.constant 0 : index
      %c0_21 = arith.constant 0 : index
      %33 = vector.load %arg9[%c0_20, %c0_21] : memref<2x256xf32, #tpu.memory_space<vmem>>, vector<2x256xf32>
      %cst_22 = arith.constant dense<0.000000e+00> : vector<2xf32>
      %34 = vector.multi_reduction <add>, %33, %cst_22 [1] : vector<2x256xf32> to vector<2xf32>
      %35 = vector.shape_cast %34 : vector<2xf32> to vector<2x1xf32>
      %cst_23 = arith.constant 5.000000e-01 : f32
      %36 = vector.broadcast %cst_23 : f32 to vector<2x1xf32>
      %37 = arith.mulf %36, %35 : vector<2x1xf32>
      %c0_24 = arith.constant 0 : index
      %c0_25 = arith.constant 0 : index
      %38 = vector.load %arg8[%c0_24, %c0_25] : memref<2x1xf32, #tpu.memory_space<vmem>>, vector<2x1xf32>
      tpu.vector_store %arg8[%c0_24, %c0_25], %37 {strides = array<i32>} : memref<2x1xf32, #tpu.memory_space<vmem>>, vector<2x1xf32>,
    } else {
    }
    return
  }
  func.func @transform_0(%arg0: i32, %arg1: i32) -> (i32, i32) {
    %c0_i32 = arith.constant 0 : i32
    return %arg0, %arg1 : i32, i32
  }
  func.func @transform_1(%arg0: i32, %arg1: i32) -> (i32, i32) {
    %c0_i32 = arith.constant 0 : i32
    return %arg0, %arg1 : i32, i32
  }
  func.func @transform_2(%arg0: i32, %arg1: i32) -> (i32, i32) {
    %c0_i32 = arith.constant 0 : i32
    return %arg0, %arg1 : i32, i32
  }
  func.func @transform_3(%arg0: i32, %arg1: i32) -> (i32, i32) {
    %c0_i32 = arith.constant 0 : i32
    return %arg0, %arg1 : i32, i32
  }
  func.func @transform_4(%arg0: i32, %arg1: i32) -> (i32, i32) {
    %c0_i32 = arith.constant 0 : i32
    return %arg0, %arg1 : i32, i32
  }
  func.func @transform_5(%arg0: i32, %arg1: i32) -> (i32, i32) {
    %c0_i32 = arith.constant 0 : i32
    return %arg0, %arg1 : i32, i32
  }
  func.func @transform_6(%arg0: i32, %arg1: i32) -> (i32, i32) {
    %c0_i32 = arith.constant 0 : i32
    %c0_i32_0 = arith.constant 0 : i32
    return %arg0, %c0_i32 : i32, i32
  }
}

module attributes {stable_mosaic.version = 11 : i64} {
  func.func @_ce_kernel(%arg0: i32, %arg1: i32, %arg2: memref<1x4x8xf32, #tpu.memory_space<vmem>>, %arg3: memref<1x1x8xi32, #tpu.memory_space<vmem>>, %arg4: memref<1x1x1xf32, #tpu.memory_space<vmem>>, %arg5: memref<1x8xf32, #tpu.memory_space<vmem>>) attributes {dimension_semantics = [#tpu.dimension_semantics<parallel>, #tpu.dimension_semantics<arbitrary>], iteration_bounds = array<i64: 2, 1>, scalar_prefetch = 0 : i64, scratch_operands = 1 : i64, tpu.core_type = #tpu.core_type<tc>, window_params = [{transform_indices = @transform_0, window_bounds = array<i64: 1, 4, 8>}, {transform_indices = @transform_1, window_bounds = array<i64: 1, 1, 8>}, {transform_indices = @transform_2, window_bounds = array<i64: 1, 1, 1>}]} {
    %c0_i32 = arith.constant 0 : i32
    %0 = arith.cmpi eq, %arg1, %c0_i32 : i32
    %1 = arith.extui %0 : i1 to i32
    %c0_i32_0 = arith.constant 0 : i32
    %2 = arith.cmpi ne, %1, %c0_i32_0 : i32
    scf.if %2 {
      %cst_17 = arith.constant 0.000000e+00 : f32
      %38 = vector.broadcast %cst_17 : f32 to vector<1x8xf32>
      %c0_18 = arith.constant 0 : index
      %c0_19 = arith.constant 0 : index
      %39 = vector.load %arg5[%c0_18, %c0_19] : memref<1x8xf32, #tpu.memory_space<vmem>>, vector<1x8xf32>
      tpu.vector_store %arg5[%c0_18, %c0_19], %38 {strides = array<i32>} : memref<1x8xf32, #tpu.memory_space<vmem>>, vector<1x8xf32>,
    } else {
    }
    %c0 = arith.constant 0 : index
    %c0_1 = arith.constant 0 : index
    %c0_2 = arith.constant 0 : index
    %3 = vector.load %arg2[%c0, %c0_1, %c0_2] : memref<1x4x8xf32, #tpu.memory_space<vmem>>, vector<1x4x8xf32>
    %4 = vector.shape_cast %3 : vector<1x4x8xf32> to vector<4x8xf32>
    %c0_3 = arith.constant 0 : index
    %c0_4 = arith.constant 0 : index
    %c0_5 = arith.constant 0 : index
    %5 = vector.load %arg3[%c0_3, %c0_4, %c0_5] : memref<1x1x8xi32, #tpu.memory_space<vmem>>, vector<1x1x8xi32>
    %6 = vector.shape_cast %5 : vector<1x1x8xi32> to vector<1x8xi32>
    %cst = arith.constant dense<0xFF800000> : vector<8xf32>
    %7 = vector.multi_reduction <maximumf>, %4, %cst [0] : vector<4x8xf32> to vector<8xf32>
    %8 = vector.shape_cast %7 : vector<8xf32> to vector<1x8xf32>
    %9 = vector.broadcast %8 : vector<1x8xf32> to vector<4x8xf32>
    %10 = arith.subf %4, %9 : vector<4x8xf32>
    %11 = math.exp %10 : vector<4x8xf32>
    %cst_6 = arith.constant dense<0.000000e+00> : vector<8xf32>
    %12 = vector.multi_reduction <add>, %11, %cst_6 [0] : vector<4x8xf32> to vector<8xf32>
    %13 = vector.shape_cast %12 : vector<8xf32> to vector<1x8xf32>
    %14 = math.log %13 : vector<1x8xf32>
    %15 = arith.addf %8, %14 : vector<1x8xf32>
    %16 = tpu.iota {dimensions = array<i32: 0>} : vector<4x8xi32>
    %17 = vector.broadcast %6 : vector<1x8xi32> to vector<4x8xi32>
    %18 = arith.cmpi eq, %16, %17 : vector<4x8xi32>
    %cst_7 = arith.constant 0.000000e+00 : f32
    %19 = vector.broadcast %cst_7 : f32 to vector<4x8xf32>
    %20 = arith.select %18, %4, %19 : vector<4x8xi1>, vector<4x8xf32>
    %cst_8 = arith.constant dense<0.000000e+00> : vector<8xf32>
    %21 = vector.multi_reduction <add>, %20, %cst_8 [0] : vector<4x8xf32> to vector<8xf32>
    %22 = vector.shape_cast %21 : vector<8xf32> to vector<1x8xf32>
    %c8_i32 = arith.constant 8 : i32
    %23 = arith.muli %arg1, %c8_i32 : i32
    %24 = tpu.iota {dimensions = array<i32: 1>} : vector<1x8xi32>
    %25 = vector.broadcast %23 : i32 to vector<1x8xi32>
    %26 = arith.addi %25, %24 : vector<1x8xi32>
    %c0_9 = arith.constant 0 : index
    %c0_10 = arith.constant 0 : index
    %27 = vector.load %arg5[%c0_9, %c0_10] : memref<1x8xf32, #tpu.memory_space<vmem>>, vector<1x8xf32>
    %c8_i32_11 = arith.constant 8 : i32
    %28 = vector.broadcast %c8_i32_11 : i32 to vector<1x8xi32>
    %29 = arith.cmpi slt, %26, %28 : vector<1x8xi32>
    %30 = arith.subf %15, %22 : vector<1x8xf32>
    %cst_12 = arith.constant 0.000000e+00 : f32
    %31 = vector.broadcast %cst_12 : f32 to vector<1x8xf32>
    %32 = arith.select %29, %30, %31 : vector<1x8xi1>, vector<1x8xf32>
    %33 = arith.addf %27, %32 : vector<1x8xf32>
    %c0_13 = arith.constant 0 : index
    %c0_14 = arith.constant 0 : index
    %34 = vector.load %arg5[%c0_13, %c0_14] : memref<1x8xf32, #tpu.memory_space<vmem>>, vector<1x8xf32>
    tpu.vector_store %arg5[%c0_13, %c0_14], %33 {strides = array<i32>} : memref<1x8xf32, #tpu.memory_space<vmem>>, vector<1x8xf32>,
    %c0_i32_15 = arith.constant 0 : i32
    %35 = arith.cmpi eq, %arg1, %c0_i32_15 : i32
    %36 = arith.extui %35 : i1 to i32
    %c0_i32_16 = arith.constant 0 : i32
    %37 = arith.cmpi ne, %36, %c0_i32_16 : i32
    scf.if %37 {
      %c0_17 = arith.constant 0 : index
      %c0_18 = arith.constant 0 : index
      %38 = vector.load %arg5[%c0_17, %c0_18] : memref<1x8xf32, #tpu.memory_space<vmem>>, vector<1x8xf32>
      %cst_19 = arith.constant dense<0.000000e+00> : vector<1xf32>
      %39 = vector.multi_reduction <add>, %38, %cst_19 [1] : vector<1x8xf32> to vector<1xf32>
      %40 = vector.shape_cast %39 : vector<1xf32> to vector<1x1xf32>
      %cst_20 = arith.constant 1.250000e-01 : f32
      %41 = vector.broadcast %cst_20 : f32 to vector<1x1xf32>
      %42 = arith.mulf %40, %41 : vector<1x1xf32>
      %c0_21 = arith.constant 0 : index
      %c0_22 = arith.constant 0 : index
      %c0_23 = arith.constant 0 : index
      %43 = vector.load %arg4[%c0_21, %c0_22, %c0_23] : memref<1x1x1xf32, #tpu.memory_space<vmem>>, vector<1x1x1xf32>
      %44 = vector.shape_cast %43 : vector<1x1x1xf32> to vector<1x1xf32>
      %45 = vector.shape_cast %42 : vector<1x1xf32> to vector<1x1x1xf32>
      tpu.vector_store %arg4[%c0_21, %c0_22, %c0_23], %45 {strides = array<i32>} : memref<1x1x1xf32, #tpu.memory_space<vmem>>, vector<1x1x1xf32>,
    } else {
    }
    return
  }
  func.func @transform_0(%arg0: i32, %arg1: i32) -> (i32, i32, i32) {
    %c0_i32 = arith.constant 0 : i32
    %c0_i32_0 = arith.constant 0 : i32
    return %arg0, %c0_i32, %arg1 : i32, i32, i32
  }
  func.func @transform_1(%arg0: i32, %arg1: i32) -> (i32, i32, i32) {
    %c0_i32 = arith.constant 0 : i32
    %c0_i32_0 = arith.constant 0 : i32
    return %arg0, %c0_i32, %arg1 : i32, i32, i32
  }
  func.func @transform_2(%arg0: i32, %arg1: i32) -> (i32, i32, i32) {
    %c0_i32 = arith.constant 0 : i32
    %c0_i32_0 = arith.constant 0 : i32
    %c0_i32_1 = arith.constant 0 : i32
    return %arg0, %c0_i32, %c0_i32_0 : i32, i32, i32
  }
}

</mosaic_0001>

<bundles_post_ra>
// kernel: _lambda_.3
= control target key start
LH: loop header
LB: loop body
LE: loop exit
PB: predicated region body
PF: predicated region fallthrough
CT: control target
= control target key end

     0   :  { %v57_v0 = vlaneseq  ;;  %v110_v1 = vmov 0.0   ;;  %v111_v5 = vmov 1983009808   ;;  %vm94_vm0 = vcmask 1041408   ;;  %s168_s0 = inlined_call_operand.vmem [shape: f32[2,256], index: 0, kind: input, shape index: {}]   ;;  %s169_s1 = inlined_call_operand.vmem [shape: f32[2,256], index: 1, kind: input, shape index: {}]   ;;  %s170_s2 = inlined_call_operand.vmem [shape: f32[2,256], index: 2, kind: input, shape index: {}]   ;;  %s171_s3 = inlined_call_operand.vmem [shape: f32[2,256], index: 3, kind: input, shape index: {}]   ;;  %s172_s4 = inlined_call_operand.vmem [shape: f32[2,256], index: 4, kind: input, shape index: {}]   ;;  %s173_s5 = inlined_call_operand.vmem [shape: f32[2,256], index: 5, kind: input, shape index: {}]   ;;  %s174_s6 = inlined_call_operand.vmem [shape: f32[2,1], index: 6, kind: output, shape index: {}]  }
   0x1   :  { %27 = vst [vmem:[#allocation2] sm:$0xf] %v110_v1  ;;  %v28_v2 = vld [vmem:[%s168_s0] sm:$0xf]  ;;  %v55_v6 = vunpack.c.l.s4 %v111_v5  ;;  %vm101_vm1 = vcmask 1024  }
   0x2   :  { %v29_v3 = vld [vmem:[%s171_s3] sm:$0xf]  ;;  %v58_v14 = vshrl.u32 %v57_v0, 7 }
   0x3   :  { %v33_v4 = vld [vmem:[%s169_s1] sm:$0xf]  ;;  %v30_v7 = vsub.f32 %v28_v2, %v29_v3  ;;  %v56_v13 = vunpack.c.0.s8 %v55_v6 }
   0x4   :  { %v34_v8 = vld [vmem:[%s172_s4] sm:$0xf] }
   0x5   :  { %v38_v9 = vld [vmem:[%s170_s2] sm:$0xf]  ;;  %v35_v11 = vsub.f32 %v33_v4, %v34_v8  ;;  %v31_v15 = vmul.f32 %v30_v7, %v30_v7  ;;  %v59_v19 = vsub.s32 %v56_v13, %v58_v14 }
   0x6   :  { %v39_v10 = vld [vmem:[%s173_s5] sm:$0xf] }
   0x7   :  { %v40_v12 = vsub.f32 %v38_v9, %v39_v10  ;;  %v36_v16 = vmul.f32 %v35_v11, %v35_v11 }
   0x8   :  { %v50_v24 = vld [vmem:[#allocation2] sm:$0xf] }
   0x9   :  { %v41_v17 = vmul.f32 %v40_v12, %v40_v12  ;;  %v37_v18 = vadd.f32 %v36_v16, %v31_v15 }
   0xb   :  { %v42_v20 = vadd.f32 %v41_v17, %v37_v18 }
   0xd   :  { %v60_v21 = vrot.slane %v42_v20, %v59_v19 }
   0xf   :  { %v61_v22 = vcombine.high %v60_v21, %v60_v21 }
  0x11   :  { %v68_v23 = vcombine.low %v60_v21, %v61_v22 }
  0x13   :  { %v75_v25 = vrot.slane %v68_v23, %v59_v19 }
  0x15   :  { %v77_v26 = vadd.f32 %v75_v25, %v50_v24 }
  0x17   :  { %78 = vst [vmem:[#allocation2] sm:$0xf] %v77_v26 }
  0x1e   :  { %v107_v27 = vld.sshfl [vmem:[#allocation2] sm:$0x33 pattern:$0x76325410] }
  0x1f   :  { %v91_v28 = vcombine.high %v107_v27, %v107_v27  ;;  %v95_v29 = vsel %vm94_vm0, %v107_v27, 0.0 }
  0x21   :  { %v96_v30 = vsel %vm94_vm0, %v91_v28, 0.0 }
  0x22   :  { %v97_v31 = vadd.f32 %v96_v30, %v95_v29 }
  0x24   :  { %98 = vadd.xlane.f32.xlu0 %v97_v31 }
  0xb1   :  { %v99_v32 = vpop.xlane.xlu0 %98 }
  0xb2   :  { %v100_v33 = vmul.f32 0.5, %v99_v32 }
  0xb4   :  { %102 = vst.msk [vmem:[%s174_s6] sm:$0x3] %vm101_vm1, %v100_v33 }

// kernel: _lambda_.2
= control target key start
LH: loop header
LB: loop body
LE: loop exit
PB: predicated region body
PF: predicated region fallthrough
CT: control target
= control target key end

     0   :  { %s399_s9 = smov 0   ;;  %s401_s10 = smov 0   ;;  %s446_s0 = inlined_call_operand.vmem [shape: f32[2,4,8], index: 0, kind: input, shape index: {}]   ;;  %s447_s1 = inlined_call_operand.vmem [shape: s32[2,1,8], index: 1, kind: input, shape index: {}]   ;;  %s448_s2 = inlined_call_operand.vmem [shape: f32[2,1,1], index: 2, kind: output, shape index: {}]  }
   0x1   :  { %s403_s11 = smov 0  }
   0x2 LB: > { %s24_s12 = sadd.s32 1, %s377_s10  ;;  %p325_p0 = scmp.ge.s32.totalorder %s381_s11, 1  ;;  %s381_s11 = sphi %s403_s11, %s12_s11   ;;  %s377_s10 = sphi %s401_s10, %s450_s10   ;;  %s373_s9 = sphi %s399_s9, %s449_s9  }
   0x3   : > { %p26_p1 = scmp.ge.s32.totalorder %s24_s12, 2  ;;  %p141_p2 = scmp.lt.s32.totalorder %s381_s11, 3 }
   0x5   : > { %s452_s12 = smov (%p26_p1, %s24_s12), 0  ;;  %p142_p3 = pnand %p325_p0, %p141_p2 }
   0x6   : > { %p169_p4 = scmp.lt.s32.totalorder (!%p142_p3), %s373_s9, 1  ;;  %vm189_vm0 = vcmask (!%p142_p3), 57344   ;;  %v383_v0 = vmov (!%p142_p3), 0.0   ;;  %vm193_vm1 = vcmask (!%p142_p3), 60416   ;;  %v214_v11 = vlaneseq (!%p142_p3) }
   0x7   : > { %145 = sbr.rel (%p142_p3) target bundleno = 233 (0xe9), region = 28  ;;  %190 = vst.msk [vmem:[#allocation2] sm:$0x1] (!%p142_p3), %vm189_vm0, %v383_v0  ;;  %vm249_vm4 = vcmask (!%p142_p3), 0  }
   0x8   : > { %v215_v12 = vshrl.u32 (!%p142_p3), %v214_v11, 7  ;;  %v231_v30 = vand.u32 (!%p142_p3), 127, %v214_v11 }
   0xa   : > { %vm235_vm3 = vcmp.lt.s32.totalorder (!%p142_p3), %v231_v30, 8 }
   0xe   : > { %s454_s9 = smov (!%p169_p4, %s373_s9), 1  ;;  %v234_v34 = vld [vmem:[#allocation2] sm:$0x1] }
   0xf   : > { %s326_s13 = sshll.u32 %s454_s9, 2  ;;  %s181_s19 = scalar_lea.vmem %s447_s1, %s454_s9 }
  0x10   : > { %s175_s16 = scalar_lea.vmem %s446_s0, %s326_s13  ;;  %v327_v13 = vld [vmem:[%s181_s19] ss:$0 sm:$0xff]  ;;  %s184_s22 = scalar_lea.vmem %s448_s2, %s454_s9 }
  0x11   : > { %v191_v1 = vld [vmem:[%s175_s16] sm:$0xf]  ;;  %vm220_vm2 = vcmp.eq.s32.totalorder %v215_v12, %v327_v13 }
  0x12   : > { %v194_v2 = vsel %vm193_vm1, %v191_v1, -inf  ;;  %v221_v14 = vsel %vm220_vm2, %v191_v1, 0.0 }
  0x13   : > { %v195_v3 = vrot.slane %v194_v2, 4  ;;  %v222_v18 = vsel %vm193_vm1, %v221_v14, 0.0 }
  0x14   : > { %v223_v20 = vrot.slane %v222_v18, 4 }
  0x15   : > { %v196_v4 = vmax.f32 %v194_v2, %v195_v3 }
  0x16   : > { %v224_v23 = vadd.f32 %v223_v20, %v222_v18 }
  0x17   : > { %v197_v5 = vrot.slane %v196_v4, 2 }
  0x18   : > { %v225_v26 = vrot.slane %v224_v23, 2 }
  0x19   : > { %v198_v6 = vmax.f32 %v196_v4, %v197_v5 }
  0x1a   : > { %v226_v27 = vadd.f32 %v225_v26, %v224_v23 }
  0x1b   : > { %v199_v7 = vrot.slane %v198_v6, 1 }
  0x1c   : > { %v227_v28 = vrot.slane %v226_v27, 1 }
  0x1d   : > { %v200_v8 = vmax.f32 %v198_v6, %v199_v7 }
  0x1e   : > { %v228_v32 = vadd.f32 %v227_v28, %v226_v27 }
  0x1f   : > { %v201_v9 = vsub.f32 %v191_v1, %v200_v8 }
  0x21   : > { %v202_v10 = vmul.f32 1.442695, %v201_v9 }
  0x23   : > { %355 = vpow2.f32 %v202_v10 }
  0x2d   : > { %v356_v15 = vpop.eup %355 }
  0x2e   : > { %v204_v16 = vsel %vm193_vm1, %v356_v15, 0.0 }
  0x2f   : > { %v205_v17 = vrot.slane %v204_v16, 4 }
  0x31   : > { %v206_v19 = vadd.f32 %v205_v17, %v204_v16 }
  0x33   : > { %v207_v21 = vrot.slane %v206_v19, 2 }
  0x35   : > { %v208_v22 = vadd.f32 %v207_v21, %v206_v19 }
  0x37   : > { %v209_v24 = vrot.slane %v208_v22, 1 }
  0x39   : > { %v210_v25 = vadd.f32 %v209_v24, %v208_v22 }
  0x3b   : > { %357 = vlog2.f32 %v210_v25 }
  0x45   : > { %v358_v29 = vpop.eup %357 }
  0x46   : > { %v212_v31 = vmul.f32 0.6931472, %v358_v29 }
  0x48   : > { %v213_v33 = vadd.f32 %v212_v31, %v200_v8 }
  0x4a   : > { %v236_v35 = vsub.f32 %v213_v33, %v228_v32 }
  0x4c   : > { %v237_v36 = vsel %vm235_vm3, %v236_v35, 0.0 }
  0x4d   : > { %v238_v37 = vadd.f32 %v237_v36, %v234_v34 }
  0x4f   : > { %240 = vst.msk [vmem:[#allocation2] sm:$0x1] %vm189_vm0, %v238_v37 }
  0x56   : > { %v244_v38 = vld [vmem:[#allocation2] sm:$0x1] }
  0x57   : > { %v245_v39 = vsel %vm189_vm0, %v244_v38, 0.0 }
  0x58   : > { %246 = vadd.xlane.f32.xlu0 %v245_v39 }
  0xe5   : > { %v247_v40 = vpop.xlane.xlu0 %246 }
  0xe6   : > { %v248_v41 = vmul.f32 0.125, %v247_v40 }
  0xe8   : > { %250 = vst.msk [vmem:[%s184_s22] sm:$0x1] %vm249_vm4, %v248_v41 }
  0xe9 PF: > { %s12_s11 = sadd.s32 1, %s381_s11   ;;  %s449_s9 = smov %s377_s10 }
  0xea   : > { %p9_p5 = scmp.ge.s32.totalorder %s12_s11, 4   ;;  %s450_s10 = smov %s452_s12 }
  0xec   :  { %11 = sbr.rel (!%p9_p5) target bundleno = 2 (0x2), region = 69 }

</bundles_post_ra>
